<compile_context>
chip_gen: v5e
topology: v5e:2x2
jax: 0.10.0
libtpu: 0.0.40
codegen_flags: <defaults>
</compile_context>

<pallas_src>
import functools

import jax
import jax.numpy as jnp
from jax.experimental import pallas as pl
from jax.experimental.pallas import tpu as pltpu


def _round_up(x, m):
    return (x + m - 1) // m * m


# ----------------------------------------------------------------------------
# Fused kernel: whole network for one batch tile
# ----------------------------------------------------------------------------
def fused_net_kernel(aw_ref, x_ref, wstk_ref, bstk_ref, wout_ref, bout_ref,
                     o_ref, *, num_layers, num_abstractions):
    """Entire AdaptiveAbstractionNet forward for one batch tile.

    aw_ref   : SMEM (L*A,)        abstraction mixing weights (flat scalars)
    x_ref    : VMEM (TB, P)       zero-padded input activations
    wstk_ref : VMEM (L*A, P, P)   stacked, padded per-abstraction weights
    bstk_ref : VMEM (L*A, 1, P)   stacked, padded per-abstraction biases
    wout_ref : VMEM (P, P)        padded output-layer weight
    bout_ref : VMEM (1, P)        padded output-layer bias
    o_ref    : VMEM (TB, P)       padded logits (lane-dense store)
    """
    x = x_ref[...]                                   # (TB, P) f32
    for l in range(num_layers):                      # static, tiny
        base = l * num_abstractions
        # Fold abstraction weights into a single effective W / b (the layer is
        # linear in W and b) -> exactly one MXU matmul per layer.
        w_eff = aw_ref[base] * wstk_ref[base]        # (P, P)  VPU
        b_eff = aw_ref[base] * bstk_ref[base]        # (1, P)
        for a in range(1, num_abstractions):
            w_eff = w_eff + aw_ref[base + a] * wstk_ref[base + a]
            b_eff = b_eff + aw_ref[base + a] * bstk_ref[base + a]
        x = jnp.dot(x, w_eff, preferred_element_type=jnp.float32) + b_eff
        x = jnp.maximum(x, 0.0)                      # ReLU
    y = jnp.dot(x, wout_ref[...], preferred_element_type=jnp.float32)
    o_ref[...] = (y + bout_ref[...]).astype(o_ref.dtype)


# ----------------------------------------------------------------------------
# Parameter construction (original, unpadded shapes — mirrors the nn.Module)
# ----------------------------------------------------------------------------
def init_params(key, input_dim, hidden_dims, num_classes, num_abstractions=3):
    params = {"adaptive": [], "out_w": None, "out_b": None}
    dims = [input_dim] + list(hidden_dims[:-1])
    for in_dim, out_dim in zip(dims, hidden_dims):
        key, kw, kb = jax.random.split(key, 3)
        # W stored as [A, in, out]  (transpose of PyTorch [out, in])
        w = jax.random.normal(kw, (num_abstractions, in_dim, out_dim),
                              jnp.float32) * (1.0 / jnp.sqrt(in_dim))
        b = jax.random.normal(kb, (num_abstractions, out_dim),
                              jnp.float32) * 0.01
        aw = jnp.full((num_abstractions,), 1.0 / num_abstractions, jnp.float32)
        params["adaptive"].append((w, b, aw))
    key, kw, kb = jax.random.split(key, 3)
    params["out_w"] = jax.random.normal(
        kw, (hidden_dims[-1], num_classes), jnp.float32) * (
            1.0 / jnp.sqrt(hidden_dims[-1]))
    params["out_b"] = jax.random.normal(kb, (num_classes,), jnp.float32) * 0.01
    return params


# ----------------------------------------------------------------------------
# Pack: zero-pad every feature dim to a common lane-dense width P (>=128)
# and stack the per-layer abstraction weights.
# ----------------------------------------------------------------------------
def pack_params(params, input_dim, hidden_dims, num_classes):
    A = params["adaptive"][0][0].shape[0]
    L = len(params["adaptive"])
    P = _round_up(max([input_dim] + list(hidden_dims) + [num_classes]), 128)

    wstk = jnp.zeros((L * A, P, P), jnp.float32)
    bstk = jnp.zeros((L * A, 1, P), jnp.float32)
    aw_flat = jnp.zeros((L * A,), jnp.float32)
    for l, (w, b, aw) in enumerate(params["adaptive"]):
        din, dout = w.shape[1], w.shape[2]
        wstk = wstk.at[l * A:(l + 1) * A, :din, :dout].set(w)
        bstk = bstk.at[l * A:(l + 1) * A, 0, :dout].set(b)
        aw_flat = aw_flat.at[l * A:(l + 1) * A].set(aw)

    wout = jnp.zeros((P, P), jnp.float32)
    wout = wout.at[:hidden_dims[-1], :num_classes].set(params["out_w"])
    bout = jnp.zeros((1, P), jnp.float32)
    bout = bout.at[0, :num_classes].set(params["out_b"])

    return {"aw": aw_flat, "wstk": wstk, "bstk": bstk,
            "wout": wout, "bout": bout,
            "num_layers": L, "num_abstractions": A, "P": P}


# ----------------------------------------------------------------------------
# Wrapper: single fused pallas_call
# ----------------------------------------------------------------------------
def adaptive_abstraction_net(packed, x, num_classes):
    B, D = x.shape
    P = packed["P"]
    L = packed["num_layers"]
    A = packed["num_abstractions"]

    # Batch tile: sublane-aligned, scales with batch (amortizes the per-tile
    # weight fold and per-grid-step overhead), capped to keep the double-
    # buffered x/o tiles small in VMEM.
    TB = min(_round_up(B, 8), 256)
    Bp = _round_up(B, TB)
    xp = jnp.zeros((Bp, P), jnp.float32).at[:B, :D].set(x)

    kern = functools.partial(fused_net_kernel,
                             num_layers=L, num_abstractions=A)

    flops = 2 * Bp * P * P * (L + 1) + 2 * (Bp // TB) * L * A * P * P
    bytes_accessed = 4 * (xp.size + packed["wstk"].size + packed["bstk"].size
                          + packed["wout"].size + packed["bout"].size + Bp * P)

    out = pl.pallas_call(
        kern,
        out_shape=jax.ShapeDtypeStruct((Bp, P), jnp.float32),
        grid=(Bp // TB,),
        in_specs=[
            pl.BlockSpec(memory_space=pltpu.MemorySpace.SMEM),       # aw
            pl.BlockSpec((TB, P), lambda i: (i, 0)),                 # x tile
            pl.BlockSpec((L * A, P, P), lambda i: (0, 0, 0)),        # W stack
            pl.BlockSpec((L * A, 1, P), lambda i: (0, 0, 0)),        # b stack
            pl.BlockSpec((P, P), lambda i: (0, 0)),                  # W_out
            pl.BlockSpec((1, P), lambda i: (0, 0)),                  # b_out
        ],
        out_specs=pl.BlockSpec((TB, P), lambda i: (i, 0)),
        compiler_params=pltpu.CompilerParams(
            dimension_semantics=("parallel",)),
        cost_estimate=pl.CostEstimate(flops=flops, transcendentals=0,
                                      bytes_accessed=bytes_accessed),
    )(packed["aw"], xp, packed["wstk"], packed["bstk"],
      packed["wout"], packed["bout"])

    return out[:B, :num_classes]


# ----------------------------------------------------------------------------
# Pure-JAX reference (unpadded, mirrors the PyTorch module exactly)
# ----------------------------------------------------------------------------
def reference_net(params, x):
    for (w, b, aw) in params["adaptive"]:
        outs = jnp.stack([x @ w[a] + b[a] for a in range(w.shape[0])], 0)
        x = jnp.maximum(jnp.einsum("a,abd->bd", aw, outs), 0.0)
    return x @ params["out_w"] + params["out_b"]


if __name__ == "__main__":
    batch = 8
    input_dim = 32
    hidden_dims = [32, 32]
    num_classes = 8
    num_abstractions = 3

    key = jax.random.PRNGKey(0)
    key_x, key_p = jax.random.split(key)
    x = jax.random.normal(key_x, (batch, input_dim), jnp.float32)

    params = init_params(key_p, input_dim, hidden_dims, num_classes,
                         num_abstractions)
    packed = pack_params(params, input_dim, hidden_dims, num_classes)

    out = adaptive_abstraction_net(packed, x, num_classes)
    out = jax.block_until_ready(out)

    ref = reference_net(params, x)
    assert out.shape == (batch, num_classes)
    assert jnp.allclose(out, ref, atol=1e-4, rtol=1e-4), "mismatch vs reference"

    print("KERNEL_OK")
</pallas_src>

<mosaic_0001>
module attributes {stable_mosaic.version = 11 : i64} {
  func.func @fused_net_kernel(%arg0: i32, %arg1: memref<6xf32, #tpu.memory_space<smem>>, %arg2: memref<8x128xf32, #tpu.memory_space<vmem>>, %arg3: memref<6x128x128xf32, #tpu.memory_space<vmem>>, %arg4: memref<6x1x128xf32, #tpu.memory_space<vmem>>, %arg5: memref<128x128xf32, #tpu.memory_space<vmem>>, %arg6: memref<1x128xf32, #tpu.memory_space<vmem>>, %arg7: memref<8x128xf32, #tpu.memory_space<vmem>>) attributes {dimension_semantics = [#tpu.dimension_semantics<parallel>], iteration_bounds = array<i64: 1>, scalar_prefetch = 0 : i64, scratch_operands = 0 : i64, tpu.core_type = #tpu.core_type<tc>, window_params = [{transform_indices = @transform_0, window_bounds = array<i64: 6>}, {transform_indices = @transform_1, window_bounds = array<i64: 8, 128>}, {pipeline_mode = #tpu.pipeline_mode<synchronous>, transform_indices = @transform_2, window_bounds = array<i64: 6, 128, 128>}, {pipeline_mode = #tpu.pipeline_mode<synchronous>, transform_indices = @transform_3, window_bounds = array<i64: 6, 1, 128>}, {pipeline_mode = #tpu.pipeline_mode<synchronous>, transform_indices = @transform_4, window_bounds = array<i64: 128, 128>}, {pipeline_mode = #tpu.pipeline_mode<synchronous>, transform_indices = @transform_5, window_bounds = array<i64: 1, 128>}, {transform_indices = @transform_6, window_bounds = array<i64: 8, 128>}]} {
    %c0 = arith.constant 0 : index
    %c0_0 = arith.constant 0 : index
    %0 = vector.load %arg2[%c0, %c0_0] : memref<8x128xf32, #tpu.memory_space<vmem>>, vector<8x128xf32>
    %c0_1 = arith.constant 0 : index
    %1 = memref.load %arg1[%c0_1] : memref<6xf32, #tpu.memory_space<smem>>
    %c0_2 = arith.constant 0 : index
    %c0_3 = arith.constant 0 : index
    %c0_4 = arith.constant 0 : index
    %2 = vector.load %arg3[%c0_2, %c0_3, %c0_4] : memref<6x128x128xf32, #tpu.memory_space<vmem>>, vector<1x128x128xf32>
    %3 = vector.shape_cast %2 : vector<1x128x128xf32> to vector<128x128xf32>
    %4 = vector.broadcast %1 : f32 to vector<128x128xf32>
    %5 = arith.mulf %4, %3 : vector<128x128xf32>
    %c0_5 = arith.constant 0 : index
    %6 = memref.load %arg1[%c0_5] : memref<6xf32, #tpu.memory_space<smem>>
    %c0_6 = arith.constant 0 : index
    %c0_7 = arith.constant 0 : index
    %c0_8 = arith.constant 0 : index
    %7 = vector.load %arg4[%c0_6, %c0_7, %c0_8] : memref<6x1x128xf32, #tpu.memory_space<vmem>>, vector<1x1x128xf32>
    %8 = vector.shape_cast %7 : vector<1x1x128xf32> to vector<1x128xf32>
    %9 = vector.broadcast %6 : f32 to vector<1x128xf32>
    %10 = arith.mulf %9, %8 : vector<1x128xf32>
    %c1 = arith.constant 1 : index
    %11 = memref.load %arg1[%c1] : memref<6xf32, #tpu.memory_space<smem>>
    %c1_9 = arith.constant 1 : index
    %c0_10 = arith.constant 0 : index
    %c0_11 = arith.constant 0 : index
    %12 = vector.load %arg3[%c1_9, %c0_10, %c0_11] : memref<6x128x128xf32, #tpu.memory_space<vmem>>, vector<1x128x128xf32>
    %13 = vector.shape_cast %12 : vector<1x128x128xf32> to vector<128x128xf32>
    %14 = vector.broadcast %11 : f32 to vector<128x128xf32>
    %15 = arith.mulf %14, %13 : vector<128x128xf32>
    %16 = arith.addf %5, %15 : vector<128x128xf32>
    %c1_12 = arith.constant 1 : index
    %17 = memref.load %arg1[%c1_12] : memref<6xf32, #tpu.memory_space<smem>>
    %c1_13 = arith.constant 1 : index
    %c0_14 = arith.constant 0 : index
    %c0_15 = arith.constant 0 : index
    %18 = vector.load %arg4[%c1_13, %c0_14, %c0_15] : memref<6x1x128xf32, #tpu.memory_space<vmem>>, vector<1x1x128xf32>
    %19 = vector.shape_cast %18 : vector<1x1x128xf32> to vector<1x128xf32>
    %20 = vector.broadcast %17 : f32 to vector<1x128xf32>
    %21 = arith.mulf %20, %19 : vector<1x128xf32>
    %22 = arith.addf %10, %21 : vector<1x128xf32>
    %c2 = arith.constant 2 : index
    %23 = memref.load %arg1[%c2] : memref<6xf32, #tpu.memory_space<smem>>
    %c2_16 = arith.constant 2 : index
    %c0_17 = arith.constant 0 : index
    %c0_18 = arith.constant 0 : index
    %24 = vector.load %arg3[%c2_16, %c0_17, %c0_18] : memref<6x128x128xf32, #tpu.memory_space<vmem>>, vector<1x128x128xf32>
    %25 = vector.shape_cast %24 : vector<1x128x128xf32> to vector<128x128xf32>
    %26 = vector.broadcast %23 : f32 to vector<128x128xf32>
    %27 = arith.mulf %26, %25 : vector<128x128xf32>
    %28 = arith.addf %16, %27 : vector<128x128xf32>
    %c2_19 = arith.constant 2 : index
    %29 = memref.load %arg1[%c2_19] : memref<6xf32, #tpu.memory_space<smem>>
    %c2_20 = arith.constant 2 : index
    %c0_21 = arith.constant 0 : index
    %c0_22 = arith.constant 0 : index
    %30 = vector.load %arg4[%c2_20, %c0_21, %c0_22] : memref<6x1x128xf32, #tpu.memory_space<vmem>>, vector<1x1x128xf32>
    %31 = vector.shape_cast %30 : vector<1x1x128xf32> to vector<1x128xf32>
    %32 = vector.broadcast %29 : f32 to vector<1x128xf32>
    %33 = arith.mulf %32, %31 : vector<1x128xf32>
    %34 = arith.addf %22, %33 : vector<1x128xf32>
    %cst = arith.constant dense<0.000000e+00> : vector<8x128xf32>
    %35 = tpu.matmul %0, %28, %cst {dimension_numbers = #tpu.dot_dimension_numbers<[1], [0], [0], [1], [0, 0, 1, 1], [], []>} : vector<8x128xf32>, vector<128x128xf32>, vector<8x128xf32> -> vector<8x128xf32>
    %36 = vector.broadcast %34 : vector<1x128xf32> to vector<8x128xf32>
    %37 = arith.addf %35, %36 : vector<8x128xf32>
    %cst_23 = arith.constant 0.000000e+00 : f32
    %38 = vector.broadcast %cst_23 : f32 to vector<8x128xf32>
    %39 = arith.maximumf %37, %38 : vector<8x128xf32>
    %c3 = arith.constant 3 : index
    %40 = memref.load %arg1[%c3] : memref<6xf32, #tpu.memory_space<smem>>
    %c3_24 = arith.constant 3 : index
    %c0_25 = arith.constant 0 : index
    %c0_26 = arith.constant 0 : index
    %41 = vector.load %arg3[%c3_24, %c0_25, %c0_26] : memref<6x128x128xf32, #tpu.memory_space<vmem>>, vector<1x128x128xf32>
    %42 = vector.shape_cast %41 : vector<1x128x128xf32> to vector<128x128xf32>
    %43 = vector.broadcast %40 : f32 to vector<128x128xf32>
    %44 = arith.mulf %43, %42 : vector<128x128xf32>
    %c3_27 = arith.constant 3 : index
    %45 = memref.load %arg1[%c3_27] : memref<6xf32, #tpu.memory_space<smem>>
    %c3_28 = arith.constant 3 : index
    %c0_29 = arith.constant 0 : index
    %c0_30 = arith.constant 0 : index
    %46 = vector.load %arg4[%c3_28, %c0_29, %c0_30] : memref<6x1x128xf32, #tpu.memory_space<vmem>>, vector<1x1x128xf32>
    %47 = vector.shape_cast %46 : vector<1x1x128xf32> to vector<1x128xf32>
    %48 = vector.broadcast %45 : f32 to vector<1x128xf32>
    %49 = arith.mulf %48, %47 : vector<1x128xf32>
    %c4 = arith.constant 4 : index
    %50 = memref.load %arg1[%c4] : memref<6xf32, #tpu.memory_space<smem>>
    %c4_31 = arith.constant 4 : index
    %c0_32 = arith.constant 0 : index
    %c0_33 = arith.constant 0 : index
    %51 = vector.load %arg3[%c4_31, %c0_32, %c0_33] : memref<6x128x128xf32, #tpu.memory_space<vmem>>, vector<1x128x128xf32>
    %52 = vector.shape_cast %51 : vector<1x128x128xf32> to vector<128x128xf32>
    %53 = vector.broadcast %50 : f32 to vector<128x128xf32>
    %54 = arith.mulf %53, %52 : vector<128x128xf32>
    %55 = arith.addf %44, %54 : vector<128x128xf32>
    %c4_34 = arith.constant 4 : index
    %56 = memref.load %arg1[%c4_34] : memref<6xf32, #tpu.memory_space<smem>>
    %c4_35 = arith.constant 4 : index
    %c0_36 = arith.constant 0 : index
    %c0_37 = arith.constant 0 : index
    %57 = vector.load %arg4[%c4_35, %c0_36, %c0_37] : memref<6x1x128xf32, #tpu.memory_space<vmem>>, vector<1x1x128xf32>
    %58 = vector.shape_cast %57 : vector<1x1x128xf32> to vector<1x128xf32>
    %59 = vector.broadcast %56 : f32 to vector<1x128xf32>
    %60 = arith.mulf %59, %58 : vector<1x128xf32>
    %61 = arith.addf %49, %60 : vector<1x128xf32>
    %c5 = arith.constant 5 : index
    %62 = memref.load %arg1[%c5] : memref<6xf32, #tpu.memory_space<smem>>
    %c5_38 = arith.constant 5 : index
    %c0_39 = arith.constant 0 : index
    %c0_40 = arith.constant 0 : index
    %63 = vector.load %arg3[%c5_38, %c0_39, %c0_40] : memref<6x128x128xf32, #tpu.memory_space<vmem>>, vector<1x128x128xf32>
    %64 = vector.shape_cast %63 : vector<1x128x128xf32> to vector<128x128xf32>
    %65 = vector.broadcast %62 : f32 to vector<128x128xf32>
    %66 = arith.mulf %65, %64 : vector<128x128xf32>
    %67 = arith.addf %55, %66 : vector<128x128xf32>
    %c5_41 = arith.constant 5 : index
    %68 = memref.load %arg1[%c5_41] : memref<6xf32, #tpu.memory_space<smem>>
    %c5_42 = arith.constant 5 : index
    %c0_43 = arith.constant 0 : index
    %c0_44 = arith.constant 0 : index
    %69 = vector.load %arg4[%c5_42, %c0_43, %c0_44] : memref<6x1x128xf32, #tpu.memory_space<vmem>>, vector<1x1x128xf32>
    %70 = vector.shape_cast %69 : vector<1x1x128xf32> to vector<1x128xf32>
    %71 = vector.broadcast %68 : f32 to vector<1x128xf32>
    %72 = arith.mulf %71, %70 : vector<1x128xf32>
    %73 = arith.addf %61, %72 : vector<1x128xf32>
    %cst_45 = arith.constant dense<0.000000e+00> : vector<8x128xf32>
    %74 = tpu.matmul %39, %67, %cst_45 {dimension_numbers = #tpu.dot_dimension_numbers<[1], [0], [0], [1], [0, 0, 1, 1], [], []>} : vector<8x128xf32>, vector<128x128xf32>, vector<8x128xf32> -> vector<8x128xf32>
    %75 = vector.broadcast %73 : vector<1x128xf32> to vector<8x128xf32>
    %76 = arith.addf %74, %75 : vector<8x128xf32>
    %cst_46 = arith.constant 0.000000e+00 : f32
    %77 = vector.broadcast %cst_46 : f32 to vector<8x128xf32>
    %78 = arith.maximumf %76, %77 : vector<8x128xf32>
    %c0_47 = arith.constant 0 : index
    %c0_48 = arith.constant 0 : index
    %79 = vector.load %arg5[%c0_47, %c0_48] : memref<128x128xf32, #tpu.memory_space<vmem>>, vector<128x128xf32>
    %cst_49 = arith.constant dense<0.000000e+00> : vector<8x128xf32>
    %80 = tpu.matmul %78, %79, %cst_49 {dimension_numbers = #tpu.dot_dimension_numbers<[1], [0], [0], [1], [0, 0, 1, 1], [], []>} : vector<8x128xf32>, vector<128x128xf32>, vector<8x128xf32> -> vector<8x128xf32>
    %c0_50 = arith.constant 0 : index
    %c0_51 = arith.constant 0 : index
    %81 = vector.load %arg6[%c0_50, %c0_51] : memref<1x128xf32, #tpu.memory_space<vmem>>, vector<1x128xf32>
    %82 = vector.broadcast %81 : vector<1x128xf32> to vector<8x128xf32>
    %83 = arith.addf %80, %82 : vector<8x128xf32>
    %c0_52 = arith.constant 0 : index
    %c0_53 = arith.constant 0 : index
    %84 = vector.load %arg7[%c0_52, %c0_53] : memref<8x128xf32, #tpu.memory_space<vmem>>, vector<8x128xf32>
    tpu.vector_store %arg7[%c0_52, %c0_53], %83 {strides = array<i32>} : memref<8x128xf32, #tpu.memory_space<vmem>>, vector<8x128xf32>,
    return
  }
  func.func @transform_0(%arg0: i32) -> i32 {
    %c0_i32 = arith.constant 0 : i32
    %c0_i32_0 = arith.constant 0 : i32
    return %c0_i32 : i32
  }
  func.func @transform_1(%arg0: i32) -> (i32, i32) {
    %c0_i32 = arith.constant 0 : i32
    %c0_i32_0 = arith.constant 0 : i32
    return %arg0, %c0_i32 : i32, i32
  }
  func.func @transform_2(%arg0: i32) -> (i32, i32, i32) {
    %c0_i32 = arith.constant 0 : i32
    %c0_i32_0 = arith.constant 0 : i32
    %c0_i32_1 = arith.constant 0 : i32
    %c0_i32_2 = arith.constant 0 : i32
    return %c0_i32, %c0_i32_0, %c0_i32_1 : i32, i32, i32
  }
  func.func @transform_3(%arg0: i32) -> (i32, i32, i32) {
    %c0_i32 = arith.constant 0 : i32
    %c0_i32_0 = arith.constant 0 : i32
    %c0_i32_1 = arith.constant 0 : i32
    %c0_i32_2 = arith.constant 0 : i32
    return %c0_i32, %c0_i32_0, %c0_i32_1 : i32, i32, i32
  }
  func.func @transform_4(%arg0: i32) -> (i32, i32) {
    %c0_i32 = arith.constant 0 : i32
    %c0_i32_0 = arith.constant 0 : i32
    %c0_i32_1 = arith.constant 0 : i32
    return %c0_i32, %c0_i32_0 : i32, i32
  }
  func.func @transform_5(%arg0: i32) -> (i32, i32) {
    %c0_i32 = arith.constant 0 : i32
    %c0_i32_0 = arith.constant 0 : i32
    %c0_i32_1 = arith.constant 0 : i32
    return %c0_i32, %c0_i32_0 : i32, i32
  }
  func.func @transform_6(%arg0: i32) -> (i32, i32) {
    %c0_i32 = arith.constant 0 : i32
    %c0_i32_0 = arith.constant 0 : i32
    return %arg0, %c0_i32 : i32, i32
  }
}

</mosaic_0001>

<bundles_post_ra>
// kernel: tpu_custom_call.1
= control target key start
LH: loop header
LB: loop body
LE: loop exit
PB: predicated region body
PF: predicated region fallthrough
CT: control target
= control target key end

     0   :  { %11 = vsyncpa [#allocation5], 0  ;;  %s873_s0 = inlined_call_operand.hbm [shape: f32[6], index: 0, kind: input, shape index: {}]   ;;  %s874_s1 = inlined_call_operand.hbm [shape: f32[8,128], index: 1, kind: input, shape index: {}]   ;;  %s875_s2 = inlined_call_operand.hbm [shape: f32[6,128,128], index: 2, kind: input, shape index: {}]   ;;  %s876_s3 = inlined_call_operand.hbm [shape: f32[6,1,128], index: 3, kind: input, shape index: {}]   ;;  %s877_s4 = inlined_call_operand.hbm [shape: f32[128,128], index: 4, kind: input, shape index: {}]   ;;  %s878_s5 = inlined_call_operand.vmem [shape: f32[1,128], index: 5, kind: input, shape index: {}]   ;;  %s879_s6 = inlined_call_operand.hbm [shape: f32[8,128], index: 6, kind: output, shape index: {}]  }
   0x1   :  { %12 = vsyncpa [#allocation3], 0 }
   0x2   :  { %13 = vsyncpa [#allocation8], 0 }
   0x3   :  { %14 = vsyncpa [#allocation11], 0  ;;  %s40_s23 = sshll.u32 %s875_s2, 4  ;;  %s41_s23 = int_to_ptr.hbm [resolvable:$true] %s40_s23 }
   0x4   :  { %15 = vsyncpa [#allocation4], 0  ;;  %s660_s24 = smov [#allocation7]   ;;  %s21_s28 = sshll.u32 %s873_s0, 4  ;;  %s22_s28 = int_to_ptr.hbm [resolvable:$true] %s21_s28 }
   0x5   :  { %s42_s25 = sshll.u32 %s660_s24, 4  ;;  %s661_s29 = smov 128   ;;  %s43_s25 = int_to_ptr.vmem [resolvable:$true] %s42_s25 }
   0x6   :  { %s662_s30 = smov 8   ;;  %s663_s7 = smov [#allocation2]  }
   0x7   :  { %48 = dma.hbm_to_vmem [thread:$0]  %s41_s23, 12288, %s43_s25, [#allocation8], %s661_s29, %s661_s29, %s662_s30  }
   0x8   :  { %24 = dma.hbm_to_smem %s22_s28, 16, %s663_s7, [#allocation5]  }
   0x9   :  { %s30_s10 = sshll.u32 %s874_s1, 4  ;;  %s664_s2 = smov [#allocation6]   ;;  %s31_s10 = int_to_ptr.hbm [resolvable:$true] %s30_s10 }
   0xa   :  { %s32_s11 = sshll.u32 %s664_s2, 4  ;;  %s53_s14 = sshll.u32 %s876_s3, 4  ;;  %s33_s11 = int_to_ptr.vmem [resolvable:$true] %s32_s11  ;;  %s54_s14 = int_to_ptr.hbm [resolvable:$true] %s53_s14 }
   0xb   :  { %35 = dma.hbm_to_vmem [thread:$0]  %s31_s10, 128, %s33_s11, [#allocation3]  }
   0xc   :  { %s665_s0 = smov [#allocation9]   ;;  %s666_s16 = smov 16  }
   0xd   :  { %s55_s15 = sshll.u32 %s665_s0, 4  ;;  %s667_s17 = smov 1   ;;  %s56_s15 = int_to_ptr.vmem [resolvable:$true] %s55_s15 }
   0xe   :  { %61 = dma.hbm_to_vmem [thread:$0]  %s54_s14, 96, %s56_s15, [#allocation8], %s666_s16, %s666_s16, %s667_s17  }
   0xf   :  { %s66_s1 = sshll.u32 %s877_s4, 4  ;;  %s668_s20 = smov [#allocation10]   ;;  %s67_s1 = int_to_ptr.hbm [resolvable:$true] %s66_s1 }
  0x10   :  { %s68_s21 = sshll.u32 %s668_s20, 4  ;;  %s69_s21 = int_to_ptr.vmem [resolvable:$true] %s68_s21 }
  0x11   :  { %74 = dma.hbm_to_vmem [thread:$0]  %s67_s1, 2048, %s69_s21, [#allocation11], %s661_s29, %s661_s29, %s662_s30  }
  0x12   :  { %650 = dma.done.wait [#allocation5], 16  }
  0x13   :  { %651 = vsyncadd [#allocation5], 4294967280 }
  0x14   :  { %652 = dma.done.wait [#allocation3], 128  }
  0x15   :  { %653 = vsyncadd [#allocation3], 4294967168 }
  0x16   :  { %654 = dma.done.wait [#allocation8], 12384  }
  0x17   :  { %655 = vsyncadd [#allocation8], 4294954912 }
  0x18   :  { %656 = dma.done.wait [#allocation11], 2048  }
  0x19   :  { %657 = vsyncadd [#allocation11], 4294965248 }
  0x1a   :  { %97 = sfence }
  0x1b   :  { %s99_s3 = sld [smem:[#allocation2]]  ;;  %v115_v0 = vld [vmem:[#allocation7 + $0x78] sm:$0xff]  ;;  %v114_v2 = vld [vmem:[#allocation7 + $0x70] sm:$0xff]  ;;  %v113_v3 = vld [vmem:[#allocation7 + $0x68] sm:$0xff]  ;;  %s669_s28 = smov [#allocation12]  }
  0x1c   :  { %s502_s22 = sld [smem:[#allocation2 + $0x1]]  ;;  %v152_v1 = vld [vmem:[#allocation7 + $0xf8] sm:$0xff]  ;;  %v151_v5 = vld [vmem:[#allocation7 + $0xf0] sm:$0xff]  ;;  %v150_v6 = vld [vmem:[#allocation7 + $0xe8] sm:$0xff]  ;;  %s487_s29 = sshll.u32 %s669_s28, 4  ;;  %s488_s29 = int_to_ptr.vmem [resolvable:$true] %s487_s29 }
  0x1d   :  { %s503_s23 = sld [smem:[#allocation2 + $0x2]]  ;;  %v207_v4 = vld [vmem:[#allocation7 + $0x178] sm:$0xff]  ;;  %v206_v8 = vld [vmem:[#allocation7 + $0x170] sm:$0xff]  ;;  %v205_v9 = vld [vmem:[#allocation7 + $0x168] sm:$0xff]  ;;  %s489_s8 = sshll.u32 %s879_s6, 4  ;;  %s490_s8 = int_to_ptr.hbm [resolvable:$true] %s489_s8 }
  0x1e   :  { %v112_v10 = vld [vmem:[#allocation7 + $0x60] sm:$0xff]  ;;  %v111_v20 = vld [vmem:[#allocation7 + $0x58] sm:$0xff]  ;;  %v110_v32 = vld [vmem:[#allocation7 + $0x50] sm:$0xff]  ;;  %s753_s4 = sld [smem:[#allocation2 + $0x3]] }
  0x1f   :  { %v149_v15 = vld [vmem:[#allocation7 + $0xe0] sm:$0xff]  ;;  %v148_v21 = vld [vmem:[#allocation7 + $0xd8] sm:$0xff]  ;;  %v147_v33 = vld [vmem:[#allocation7 + $0xd0] sm:$0xff]  ;;  %s757_s24 = sld [smem:[#allocation2 + $0x4]] }
  0x20   :  { %v204_v26 = vld [vmem:[#allocation7 + $0x160] sm:$0xff]  ;;  %v203_v31 = vld [vmem:[#allocation7 + $0x158] sm:$0xff]  ;;  %v202_v36 = vld [vmem:[#allocation7 + $0x150] sm:$0xff]  ;;  %s765_s25 = sld [smem:[#allocation2 + $0x5]] }
  0x21   :  { %v720_v7 = vstv %s99_s3  ;;  %v109_v37 = vld [vmem:[#allocation7 + $0x48] sm:$0xff]  ;;  %v108_v43 = vld [vmem:[#allocation7 + $0x40] sm:$0xff]  ;;  %v107_v50 = vld [vmem:[#allocation7 + $0x38] sm:$0xff] }
  0x22   :  { %v132_v11 = vmul.f32 %v720_v7, %v115_v0  ;;  %v723_v12 = vstv %s502_s22  ;;  %v131_v13 = vmul.f32 %v720_v7, %v114_v2  ;;  %v130_v14 = vmul.f32 %v720_v7, %v113_v3  ;;  %v146_v38 = vld [vmem:[#allocation7 + $0xc8] sm:$0xff]  ;;  %v145_v44 = vld [vmem:[#allocation7 + $0xc0] sm:$0xff]  ;;  %v144_v51 = vld [vmem:[#allocation7 + $0xb8] sm:$0xff] }
  0x23   :  { %v169_v16 = vmul.f32 %v723_v12, %v152_v1  ;;  %v728_v17 = vstv %s503_s23  ;;  %v168_v18 = vmul.f32 %v723_v12, %v151_v5  ;;  %v167_v19 = vmul.f32 %v723_v12, %v150_v6  ;;  %v201_v49 = vld [vmem:[#allocation7 + $0x148] sm:$0xff]  ;;  %v200_v56 = vld [vmem:[#allocation7 + $0x140] sm:$0xff]  ;;  %v106_v57 = vld [vmem:[#allocation7 + $0x30] sm:$0xff] }
  0x24   :  { %v224_v22 = vmul.f32 %v728_v17, %v207_v4  ;;  %v223_v23 = vmul.f32 %v728_v17, %v206_v8  ;;  %v222_v24 = vmul.f32 %v728_v17, %v205_v9  ;;  %v129_v25 = vmul.f32 %v720_v7, %v112_v10  ;;  %v199_v61 = vld [vmem:[#allocation7 + $0x138] sm:$0xff]  ;;  %v143_v62 = vld [vmem:[#allocation7 + $0xb0] sm:$0xff]  ;;  %v105_v4 = vld [vmem:[#allocation7 + $0x28] sm:$0xff] }
  0x25   :  { %v185_v27 = vadd.f32 %v169_v16, %v132_v11  ;;  %v184_v28 = vadd.f32 %v168_v18, %v131_v13  ;;  %v183_v29 = vadd.f32 %v167_v19, %v130_v14  ;;  %v166_v30 = vmul.f32 %v723_v12, %v149_v15  ;;  %v198_v3 = vld [vmem:[#allocation7 + $0x130] sm:$0xff]  ;;  %v142_v5 = vld [vmem:[#allocation7 + $0xa8] sm:$0xff]  ;;  %v104_v13 = vld [vmem:[#allocation7 + $0x20] sm:$0xff] }
  0x26   :  { %v128_v34 = vmul.f32 %v720_v7, %v111_v20  ;;  %v165_v35 = vmul.f32 %v723_v12, %v148_v21  ;;  %v221_v42 = vmul.f32 %v728_v17, %v204_v26  ;;  %v220_v46 = vmul.f32 %v728_v17, %v203_v31  ;;  %v197_v11 = vld [vmem:[#allocation7 + $0x128] sm:$0xff]  ;;  %v141_v14 = vld [vmem:[#allocation7 + $0xa0] sm:$0xff]  ;;  %v103_v21 = vld [vmem:[#allocation7 + $0x18] sm:$0xff] }
  0x27   :  { %v240_v39 = vadd.f32 %v224_v22, %v185_v27  ;;  %v239_v40 = vadd.f32 %v223_v23, %v184_v28  ;;  %v182_v41 = vadd.f32 %v166_v30, %v129_v25  ;;  %v127_v47 = vmul.f32 %v720_v7, %v110_v32  ;;  %v196_v20 = vld [vmem:[#allocation7 + $0x120] sm:$0xff]  ;;  %v140_v22 = vld [vmem:[#allocation7 + $0x98] sm:$0xff]  ;;  %v102_v28 = vld [vmem:[#allocation7 + $0x10] sm:$0xff] }
  0x28   :  { %v181_v45 = vadd.f32 %v165_v35, %v128_v34  ;;  %v164_v48 = vmul.f32 %v723_v12, %v147_v33  ;;  %v238_v52 = vadd.f32 %v222_v24, %v183_v29  ;;  %v219_v53 = vmul.f32 %v728_v17, %v202_v36  ;;  %v195_v27 = vld [vmem:[#allocation7 + $0x118] sm:$0xff]  ;;  %v139_v33 = vld [vmem:[#allocation7 + $0x90] sm:$0xff] }
  0x29   :  { %248 = vmatpush.msra.mxu0 %v240_v39  ;;  %v126_v54 = vmul.f32 %v720_v7, %v109_v37  ;;  %v163_v55 = vmul.f32 %v723_v12, %v146_v38  ;;  %v125_v59 = vmul.f32 %v720_v7, %v108_v43  ;;  %v162_v60 = vmul.f32 %v723_v12, %v145_v44  ;;  %v101_v38 = vld [vmem:[#allocation7 + $0x8] sm:$0xff]  ;;  %v194_v44 = vld [vmem:[#allocation7 + $0x110] sm:$0xff] }
  0x2a   :  { %v180_v58 = vadd.f32 %v164_v48, %v127_v47  ;;  %v237_v63 = vadd.f32 %v221_v42, %v182_v41  ;;  %v218_v0 = vmul.f32 %v728_v17, %v201_v49  ;;  %v124_v1 = vmul.f32 %v720_v7, %v107_v50  ;;  %v138_v39 = vld [vmem:[#allocation7 + $0x88] sm:$0xff]  ;;  %v100_v50 = vld [vmem:[#allocation7] sm:$0xff] }
  0x2b   :  { %249 = vmatpush.msra.mxu0 %v239_v40  ;;  %v161_v2 = vmul.f32 %v723_v12, %v144_v51  ;;  %v236_v6 = vadd.f32 %v220_v46, %v181_v45  ;;  %v179_v8 = vadd.f32 %v163_v55, %v126_v54  ;;  %v217_v9 = vmul.f32 %v728_v17, %v200_v56  ;;  %v193_v45 = vld [vmem:[#allocation7 + $0x108] sm:$0xff]  ;;  %v137_v55 = vld [vmem:[#allocation7 + $0x80] sm:$0xff]  ;;  %v286_v56 = vld [vmem:[#allocation7 + $0x1f8] sm:$0xff] }
  0x2c   :  { %v123_v10 = vmul.f32 %v720_v7, %v106_v57  ;;  %v235_v15 = vadd.f32 %v219_v53, %v180_v58  ;;  %v178_v16 = vadd.f32 %v162_v60, %v125_v59  ;;  %v216_v18 = vmul.f32 %v728_v17, %v199_v61  ;;  %v324_v57 = vld [vmem:[#allocation7 + $0x278] sm:$0xff] }
  0x2d   :  { %250 = vmatpush.msra.mxu0 %v238_v52  ;;  %v160_v19 = vmul.f32 %v723_v12, %v143_v62  ;;  %v177_v23 = vadd.f32 %v161_v2, %v124_v1  ;;  %v215_v24 = vmul.f32 %v728_v17, %v198_v3  ;;  %v122_v25 = vmul.f32 %v720_v7, %v105_v4  ;;  %v192_v62 = vld [vmem:[#allocation7 + $0x100] sm:$0xff] }
  0x2e   :  { %v159_v26 = vmul.f32 %v723_v12, %v142_v5  ;;  %v214_v30 = vmul.f32 %v728_v17, %v197_v11  ;;  %v121_v31 = vmul.f32 %v720_v7, %v104_v13  ;;  %v158_v32 = vmul.f32 %v723_v12, %v141_v14  ;;  %v379_v5 = vld [vmem:[#allocation7 + $0x2f8] sm:$0xff]  ;;  %v284_v13 = vld [vmem:[#allocation7 + $0x1e8] sm:$0xff] }
  0x2f   :  { %251 = vmatpush.msra.mxu0 %v237_v63  ;;  %v176_v29 = vadd.f32 %v160_v19, %v123_v10  ;;  %v213_v35 = vmul.f32 %v728_v17, %v196_v20  ;;  %v120_v36 = vmul.f32 %v720_v7, %v103_v21  ;;  %v157_v37 = vmul.f32 %v723_v12, %v140_v22  ;;  %v285_v63 = vld [vmem:[#allocation7 + $0x1f0] sm:$0xff]  ;;  %v322_v14 = vld [vmem:[#allocation7 + $0x268] sm:$0xff]  ;;  %v283_v21 = vld [vmem:[#allocation7 + $0x1e0] sm:$0xff] }
  0x30   :  { %v175_v34 = vadd.f32 %v159_v26, %v122_v25  ;;  %v234_v40 = vadd.f32 %v218_v0, %v179_v8  ;;  %v174_v41 = vadd.f32 %v158_v32, %v121_v31  ;;  %v212_v42 = vmul.f32 %v728_v17, %v195_v27  ;;  %v323_v0 = vld [vmem:[#allocation7 + $0x270] sm:$0xff]  ;;  %v321_v22 = vld [vmem:[#allocation7 + $0x260] sm:$0xff] }
  0x31   :  { %252 = vmatpush.msra.mxu0 %v236_v6  ;;  %v119_v43 = vmul.f32 %v720_v7, %v102_v28  ;;  %v233_v46 = vadd.f32 %v217_v9, %v178_v16  ;;  %v232_v47 = vadd.f32 %v216_v18, %v177_v23  ;;  %v173_v48 = vadd.f32 %v157_v37, %v120_v36  ;;  %v378_v6 = vld [vmem:[#allocation7 + $0x2f0] sm:$0xff]  ;;  %v376_v23 = vld [vmem:[#allocation7 + $0x2e0] sm:$0xff]  ;;  %v282_v28 = vld [vmem:[#allocation7 + $0x1d8] sm:$0xff] }
  0x32   :  { %v156_v49 = vmul.f32 %v723_v12, %v139_v33  ;;  %v231_v51 = vadd.f32 %v215_v24, %v176_v29  ;;  %v773_v52 = vadd.f32 %v214_v30, %v175_v34  ;;  %v118_v53 = vmul.f32 %v720_v7, %v101_v38  ;;  %v320_v29 = vld [vmem:[#allocation7 + $0x258] sm:$0xff]  ;;  %v319_v36 = vld [vmem:[#allocation7 + $0x250] sm:$0xff] }
  0x33   :  { %253 = vmatpush.msra.mxu0 %v235_v15  ;;  %v155_v54 = vmul.f32 %v723_v12, %v138_v39  ;;  %v777_v58 = vadd.f32 %v213_v35, %v174_v41  ;;  %v211_v60 = vmul.f32 %v728_v17, %v194_v44  ;;  %v781_v61 = vmul.f32 %v728_v17, %v193_v45  ;;  %v377_v15 = vld [vmem:[#allocation7 + $0x2e8] sm:$0xff]  ;;  %v375_v30 = vld [vmem:[#allocation7 + $0x2d8] sm:$0xff]  ;;  %v281_v35 = vld [vmem:[#allocation7 + $0x1d0] sm:$0xff] }
  0x34   :  { %v172_v59 = vadd.f32 %v156_v49, %v119_v43  ;;  %v783_v1 = vadd.f32 %v212_v42, %v173_v48  ;;  %v117_v2 = vmul.f32 %v720_v7, %v100_v50  ;;  %v787_v3 = vstv %s753_s4  ;;  %v280_v41 = vld [vmem:[#allocation7 + $0x1c8] sm:$0xff] }
  0x35   :  { %254 = vmatpush.msra.mxu0 %v234_v40  ;;  %v790_v4 = vstv %s757_s24  ;;  %v792_v8 = vadd.f32 %v155_v54, %v118_v53  ;;  %v154_v9 = vmul.f32 %v723_v12, %v137_v55  ;;  %v303_v10 = vmul.f32 %v787_v3, %v286_v56  ;;  %v373_v54 = vld [vmem:[#allocation7 + $0x2c8] sm:$0xff]  ;;  %v279_v55 = vld [vmem:[#allocation7 + $0x1c0] sm:$0xff] }
  0x36   :  { %v341_v11 = vmul.f32 %v790_v4, %v324_v57  ;;  %v798_v16 = vmul.f32 %v728_v17, %v192_v62  ;;  %v801_v18 = vstv %s765_s25  ;;  %v302_v19 = vmul.f32 %v787_v3, %v285_v63  ;;  %v317_v56 = vld [vmem:[#allocation7 + $0x240] sm:$0xff]  ;;  %v278_v62 = vld [vmem:[#allocation7 + $0x1b8] sm:$0xff] }
  0x37   :  { %255 = vmatpush.msra.mxu0 %v233_v46  ;;  %v340_v20 = vmul.f32 %v790_v4, %v323_v0  ;;  %v805_v24 = vadd.f32 %v211_v60, %v172_v59  ;;  %v396_v26 = vmul.f32 %v801_v18, %v379_v5  ;;  %v395_v27 = vmul.f32 %v801_v18, %v378_v6  ;;  %v374_v46 = vld [vmem:[#allocation7 + $0x2d0] sm:$0xff]  ;;  %v316_v63 = vld [vmem:[#allocation7 + $0x238] sm:$0xff] }
  0x38   :  { %v357_v25 = vadd.f32 %v341_v11, %v303_v10  ;;  %v301_v32 = vmul.f32 %v787_v3, %v284_v13  ;;  %v339_v33 = vmul.f32 %v790_v4, %v322_v14  ;;  %v394_v34 = vmul.f32 %v801_v18, %v377_v15  ;;  %v372_v11 = vld [vmem:[#allocation7 + $0x2c0] sm:$0xff]  ;;  %v277_v13 = vld [vmem:[#allocation7 + $0x1b0] sm:$0xff] }
  0x39   :  { %256 = vmatpush.msra.mxu0 %v232_v47  ;;  %v356_v31 = vadd.f32 %v340_v20, %v302_v19  ;;  %v300_v38 = vmul.f32 %v787_v3, %v283_v21  ;;  %v338_v39 = vmul.f32 %v790_v4, %v321_v22  ;;  %v393_v40 = vmul.f32 %v801_v18, %v376_v23  ;;  %v318_v47 = vld [vmem:[#allocation7 + $0x248] sm:$0xff]  ;;  %v315_v14 = vld [vmem:[#allocation7 + $0x230] sm:$0xff]  ;;  %v371_v23 = vld [vmem:[#allocation7 + $0x2b8] sm:$0xff] }
  0x3a   :  { %v412_v37 = vadd.f32 %v396_v26, %v357_v25  ;;  %v355_v43 = vadd.f32 %v339_v33, %v301_v32  ;;  %v299_v44 = vmul.f32 %v787_v3, %v282_v28  ;;  %v337_v45 = vmul.f32 %v790_v4, %v320_v29  ;;  %v276_v25 = vld [vmem:[#allocation7 + $0x1a8] sm:$0xff] }
  0x3b   :  { %257 = vmatpush.msra.mxu0 %v231_v51  ;;  %v411_v42 = vadd.f32 %v395_v27, %v356_v31  ;;  %v354_v48 = vadd.f32 %v338_v39, %v300_v38  ;;  %v392_v49 = vmul.f32 %v801_v18, %v375_v30  ;;  %v298_v50 = vmul.f32 %v787_v3, %v281_v35  ;;  %v314_v26 = vld [vmem:[#allocation7 + $0x228] sm:$0xff]  ;;  %v370_v30 = vld [vmem:[#allocation7 + $0x2b0] sm:$0xff]  ;;  %v275_v31 = vld [vmem:[#allocation7 + $0x1a0] sm:$0xff] }
  0x3c   :  { %420 = vmatpush.msra.mxu1 %v412_v37  ;;  %v336_v53 = vmul.f32 %v790_v4, %v319_v36  ;;  %v170_v51 = vadd.f32 %v154_v9, %v117_v2  ;;  %v410_v57 = vadd.f32 %v394_v34, %v355_v43  ;;  %v353_v59 = vadd.f32 %v337_v45, %v299_v44  ;;  %v313_v35 = vld [vmem:[#allocation7 + $0x220] sm:$0xff]  ;;  %v369_v39 = vld [vmem:[#allocation7 + $0x2a8] sm:$0xff]  ;;  %v274_v43 = vld [vmem:[#allocation7 + $0x198] sm:$0xff] }
  0x3d   :  { %258 = vmatpush.msra.mxu0 %v773_v52  ;;  %v297_v60 = vmul.f32 %v787_v3, %v280_v41  ;;  %v409_v0 = vadd.f32 %v393_v40, %v354_v48  ;;  %v391_v6 = vmul.f32 %v801_v18, %v374_v46  ;;  %v335_v10 = vmul.f32 %v790_v4, %v318_v47  ;;  %v133_v36 = vld [vmem:[#allocation9] sm:$0x1]  ;;  %v187_v37 = vld [vmem:[#allocation9 + $0x1] sm:$0x1]  ;;  %v98_v40 = vld [vmem:[#allocation6] sm:$0xff] }
  0x3e   :  { %421 = vmatpush.msra.mxu1 %v411_v42  ;;  %v352_v5 = vadd.f32 %v336_v53, %v298_v50  ;;  %v226_v52 = vadd.f32 %v781_v61, %v792_v8  ;;  %v390_v2 = vmul.f32 %v801_v18, %v373_v54  ;;  %v296_v9 = vmul.f32 %v787_v3, %v279_v55  ;;  %v312_v44 = vld [vmem:[#allocation7 + $0x218] sm:$0xff]  ;;  %v368_v54 = vld [vmem:[#allocation7 + $0x2a0] sm:$0xff] }
  0x3f   :  { %259 = vmatpush.msra.mxu0 %v777_v58  ;;  %v334_v15 = vmul.f32 %v790_v4, %v317_v56  ;;  %v408_v19 = vadd.f32 %v392_v49, %v353_v59  ;;  %v351_v20 = vadd.f32 %v335_v10, %v297_v60  ;;  %v295_v21 = vmul.f32 %v787_v3, %v278_v62  ;;  %v367_v59 = vld [vmem:[#allocation7 + $0x298] sm:$0xff]  ;;  %v273_v10 = vld [vmem:[#allocation7 + $0x190] sm:$0xff] }
  0x40   :  { %422 = vmatpush.msra.mxu1 %v410_v57  ;;  %v333_v22 = vmul.f32 %v790_v4, %v316_v63  ;;  %v389_v61 = vmul.f32 %v801_v18, %v372_v11  ;;  %v294_v8 = vmul.f32 %v787_v3, %v277_v13  ;;  %v332_v27 = vmul.f32 %v790_v4, %v315_v14  ;;  %v311_v11 = vld [vmem:[#allocation7 + $0x210] sm:$0xff] }
  0x41   :  { %260 = vmatpush.msra.mxu0 %v783_v1  ;;  %v350_v58 = vadd.f32 %v334_v15, %v296_v9  ;;  %v225_v28 = vadd.f32 %v798_v16, %v170_v51  ;;  %v407_v29 = vadd.f32 %v391_v6, %v352_v5  ;;  %v388_v33 = vmul.f32 %v801_v18, %v371_v23  ;;  %v242_v16 = vld [vmem:[#allocation9 + $0x2] sm:$0x1]  ;;  %v310_v9 = vld [vmem:[#allocation7 + $0x208] sm:$0xff] }
  0x42   :  { %423 = vmatpush.msra.mxu1 %v409_v0  ;;  %v349_v32 = vadd.f32 %v333_v22, %v295_v21  ;;  %v293_v1 = vmul.f32 %v787_v3, %v276_v25  ;;  %v331_v34 = vmul.f32 %v790_v4, %v314_v26  ;;  %v406_v38 = vadd.f32 %v390_v2, %v351_v20  ;;  %v272_v2 = vld [vmem:[#allocation7 + $0x188] sm:$0xff]  ;;  %v271_v23 = vld [vmem:[#allocation7 + $0x180] sm:$0xff] }
  0x43   :  { %261 = vmatpush.msra.mxu0 %v805_v24  ;;  %v405_v41 = vadd.f32 %v389_v61, %v350_v58  ;;  %v348_v42 = vadd.f32 %v332_v27, %v294_v8  ;;  %v387_v24 = vmul.f32 %v801_v18, %v370_v30  ;;  %v292_v45 = vmul.f32 %v787_v3, %v275_v31  ;;  %v365_v22 = vld [vmem:[#allocation7 + $0x288] sm:$0xff]  ;;  %v309_v25 = vld [vmem:[#allocation7 + $0x200] sm:$0xff] }
  0x44   :  { %424 = vmatpush.msra.mxu1 %v408_v19  ;;  %v330_v46 = vmul.f32 %v790_v4, %v313_v35  ;;  %v134_v47 = vmul.f32 %v133_v36, %v720_v7  ;;  %v188_v48 = vmul.f32 %v187_v37, %v723_v12  ;;  %v404_v49 = vadd.f32 %v388_v33, %v349_v32  ;;  %v456_v33 = vld [vmem:[#allocation10 + $0x78] sm:$0xff]  ;;  %v453_v35 = vld [vmem:[#allocation10 + $0x60] sm:$0xff]  ;;  %v451_v37 = vld [vmem:[#allocation10 + $0x50] sm:$0xff] }
  0x45   :  { %262 = vmatpush.msra.mxu0 %v226_v52  ;;  %v347_v50 = vadd.f32 %v331_v34, %v293_v1  ;;  %v386_v53 = vmul.f32 %v801_v18, %v369_v39  ;;  %v243_v55 = vmul.f32 %v242_v16, %v728_v17  ;;  %v291_v56 = vmul.f32 %v787_v3, %v274_v43  ;;  %v366_v52 = vld [vmem:[#allocation7 + $0x290] sm:$0xff]  ;;  %v452_v36 = vld [vmem:[#allocation10 + $0x58] sm:$0xff]  ;;  %v449_v39 = vld [vmem:[#allocation10 + $0x40] sm:$0xff] }
  0x46   :  { %425 = vmatpush.msra.mxu1 %v407_v29  ;;  %v329_v51 = vmul.f32 %v790_v4, %v312_v44  ;;  %v189_v57 = vadd.f32 %v188_v48, %v134_v47  ;;  %v403_v7 = vadd.f32 %v387_v24, %v348_v42  ;;  %v346_v60 = vadd.f32 %v330_v46, %v292_v45  ;;  %v455_v1 = vld [vmem:[#allocation10 + $0x70] sm:$0xff]  ;;  %v454_v34 = vld [vmem:[#allocation10 + $0x68] sm:$0xff]  ;;  %v448_v16 = vld [vmem:[#allocation10 + $0x38] sm:$0xff] }
  0x47   :  { %263 = vmatpush.msra.mxu0 %v225_v28  ;;  %v385_v12 = vmul.f32 %v801_v18, %v368_v54  ;;  %v402_v63 = vadd.f32 %v386_v53, %v347_v50  ;;  %v384_v17 = vmul.f32 %v801_v18, %v367_v59  ;;  %v290_v13 = vmul.f32 %v787_v3, %v273_v10  ;;  %v364_v28 = vld [vmem:[#allocation7 + $0x280] sm:$0xff]  ;;  %v443_v47 = vld [vmem:[#allocation10 + $0x10] sm:$0xff]  ;;  %v442_v48 = vld [vmem:[#allocation10 + $0x8] sm:$0xff] }
  0x48   :  { %264 = vmatmul.f32.vlgmr.msra.gmra.mxu0 %v98_v40  ;;  %426 = vmatpush.msra.mxu1 %v406_v38  ;;  %v851_v62 = vadd.f32 %v243_v55, %v189_v57  ;;  %v345_v0 = vadd.f32 %v329_v51, %v291_v56  ;;  %v328_v14 = vmul.f32 %v790_v4, %v311_v11  ;;  %v450_v38 = vld [vmem:[#allocation10 + $0x48] sm:$0xff]  ;;  %v447_v40 = vld [vmem:[#allocation10 + $0x30] sm:$0xff]  ;;  %v445_v42 = vld [vmem:[#allocation10 + $0x20] sm:$0xff] }
  0x49   :  { %v401_v5 = vadd.f32 %v385_v12, %v346_v60  ;;  %v383_v19 = vmul.f32 %v801_v18, %v366_v52  ;;  %v289_v20 = vmul.f32 %v787_v3, %v272_v2  ;;  %v327_v21 = vmul.f32 %v790_v4, %v310_v9  ;;  %461 = vmatpush.msra.mxu2 %v456_v33  ;;  %v444_v24 = vld [vmem:[#allocation10 + $0x18] sm:$0xff] }
  0x4a   :  { %427 = vmatpush.msra.mxu1 %v405_v41  ;;  %v400_v6 = vadd.f32 %v384_v17, %v345_v0  ;;  %v344_v15 = vadd.f32 %v328_v14, %v290_v13  ;;  %v382_v61 = vmul.f32 %v801_v18, %v365_v22  ;;  %v288_v8 = vmul.f32 %v787_v3, %v271_v23  ;;  %v446_v41 = vld [vmem:[#allocation10 + $0x28] sm:$0xff]  ;;  %v305_v50 = vld [vmem:[#allocation9 + $0x3] sm:$0x1]  ;;  %v359_v53 = vld [vmem:[#allocation9 + $0x4] sm:$0x1] }
  0x4b   :  { %v343_v58 = vadd.f32 %v327_v21, %v289_v20  ;;  %v326_v27 = vmul.f32 %v790_v4, %v309_v25  ;;  %v381_v30 = vmul.f32 %v801_v18, %v364_v28  ;;  %462 = vmatpush.msra.mxu2 %v455_v1  ;;  %v246_v43 = vperm.slane %v851_v62, 0  ;;  %v414_v56 = vld [vmem:[#allocation9 + $0x5] sm:$0x1] }
  0x4c   :  { %428 = vmatpush.msra.mxu1 %v404_v49  ;;  %v399_v26 = vadd.f32 %v383_v19, %v344_v15  ;;  %v441_v49 = vld [vmem:[#allocation10] sm:$0xff]  ;;  %v306_v54 = vmul.f32 %v305_v50, %v787_v3  ;;  %v360_v55 = vmul.f32 %v359_v53, %v790_v4  ;;  %v415_v57 = vmul.f32 %v414_v56, %v801_v18 }
  0x4d   :  { %v398_v29 = vadd.f32 %v382_v61, %v343_v58  ;;  %v342_v31 = vadd.f32 %v326_v27, %v288_v8  ;;  %463 = vmatpush.msra.mxu2 %v454_v34 }
  0x4e   :  { %429 = vmatpush.msra.mxu1 %v403_v7  ;;  %v361_v51 = vadd.f32 %v360_v55, %v306_v54 }
  0x4f   :  { %v397_v32 = vadd.f32 %v381_v30, %v342_v31  ;;  %464 = vmatpush.msra.mxu2 %v453_v35 }
  0x50   :  { %430 = vmatpush.msra.mxu1 %v402_v63  ;;  %v416_v59 = vadd.f32 %v415_v57, %v361_v51  ;;  %v517_v63 = vld [vmem:[%s878_s5] ss:$0 sm:$0xff] }
  0x51   :  { %465 = vmatpush.msra.mxu2 %v452_v36 }
  0x52   :  { %431 = vmatpush.msra.mxu1 %v401_v5  ;;  %v418_v7 = vperm.slane %v416_v59, 0 }
  0x53   :  { %466 = vmatpush.msra.mxu2 %v451_v37 }
  0x54   :  { %432 = vmatpush.msra.mxu1 %v400_v6 }
  0x55   :  { %467 = vmatpush.msra.mxu2 %v450_v38 }
  0x56   :  { %433 = vmatpush.msra.mxu1 %v399_v26 }
  0x57   :  { %468 = vmatpush.msra.mxu2 %v449_v39 }
  0x58   :  { %434 = vmatpush.msra.mxu1 %v398_v29 }
  0x59   :  { %469 = vmatpush.msra.mxu2 %v448_v16 }
  0x5a   :  { %435 = vmatpush.msra.mxu1 %v397_v32 }
  0x5b   :  { %470 = vmatpush.msra.mxu2 %v447_v40 }
  0x5d   :  { %471 = vmatpush.msra.mxu2 %v446_v41 }
  0x5f   :  { %472 = vmatpush.msra.mxu2 %v445_v42 }
  0x61   :  { %473 = vmatpush.msra.mxu2 %v444_v24 }
  0x63   :  { %474 = vmatpush.msra.mxu2 %v443_v47 }
  0x65   :  { %475 = vmatpush.msra.mxu2 %v442_v48 }
  0x67   :  { %476 = vmatpush.msra.mxu2 %v441_v49 }
  0xc5   :  { %v265_v44 = vpop.f32.mrf.mxu0 }
  0xc6   :  { %v266_v45 = vadd.f32 %v265_v44, %v246_v43 }
  0xc8   :  { %v268_v46 = vmax.f32 %v266_v45, 0.0 }
  0xca   :  { %436 = vmatmul.f32.vlgmr.msra.gmra.mxu1 %v268_v46 }
 0x147   :  { %v437_v60 = vpop.f32.mrf.mxu1 }
 0x148   :  { %v438_v12 = vadd.f32 %v437_v60, %v418_v7 }
 0x14a   :  { %v440_v62 = vmax.f32 %v438_v12, 0.0 }
 0x14c   :  { %477 = vmatmul.f32.vlgmr.msra.gmra.mxu2 %v440_v62 }
 0x1cf   :  { %v478_v3 = vpop.f32.mrf.mxu2 }
 0x1d0   :  { %v479_v4 = vadd.f32 %v517_v63, %v478_v3 }
 0x1d2   :  { %481 = vst [vmem:[#allocation12] sm:$0xff] %v479_v4 }
 0x1d3   :  { %492 = dma.vmem_to_hbm [thread:$0]  %s488_s29, 128, %s490_s8, [#allocation4]  }
 0x1d4   :  { %658 = dma.done.wait [#allocation4], 128  }
 0x1d5   :  { %659 = vsyncadd [#allocation4], 4294967168 }
 0x1d6   :  { %497 = vsyncpa [#allocation3], 1 }
 0x1d7   :  { %498 = vsyncpa [#allocation8], 1 }
 0x1d8   :  { %499 = vsyncpa [#allocation11], 1 }
 0x1d9   :  { %500 = vsyncpa [#allocation4], 1 }
 0x1da   :  { %501 = vsyncpa [#allocation5], 1 }

</bundles_post_ra>
